<compile_context>
chip_gen: v7x
topology: tpu7x:2x2x1
jax: 0.10.0
libtpu: 0.0.40
codegen_flags: <defaults>
</compile_context>

<pallas_src>
import jax
import jax.numpy as jnp
from jax.experimental import pallas as pl
from jax.experimental.pallas import tpu as pltpu


def _round_up(x, m):
    return (x + m - 1) // m * m


# ---------------------------------------------------------------------------
# pass 1: conv matmul (bf16 MXU, f32 accumulation) + per-tile channel stats
# ---------------------------------------------------------------------------
def _conv_stats_kernel(w_ref, p_ref, y_ref, psum_ref, psq_ref):
    # w_ref:    (C_pads, K_pad)  bf16, VMEM-resident (constant block index)
    # p_ref:    (K_pad, tm)      bf16, one M tile of the transposed patch matrix
    # y_ref:    (C_pads, tm)     bf16 conv output tile
    # psum/psq: (1, C_pads, 8)   f32 per-tile channel sums / sums of squares
    acc = jnp.dot(w_ref[...], p_ref[...], preferred_element_type=jnp.float32)
    y_ref[...] = acc.astype(y_ref.dtype)
    # Per-channel (= per-row) sums via a ones-matmul on the MXU instead of an
    # XLU lane sweep; every column of the (C_pads, 8) result equals the row sum.
    ones = jnp.ones((acc.shape[1], 8), dtype=jnp.float32)
    psum_ref[0] = jnp.dot(acc, ones, preferred_element_type=jnp.float32)
    psq_ref[0] = jnp.dot(acc * acc, ones, preferred_element_type=jnp.float32)


# ---------------------------------------------------------------------------
# pass 2: folded BatchNorm (per-channel scale/shift) + ReLU, in place on y
# ---------------------------------------------------------------------------
def _bn_relu_kernel(y_ref, scale_ref, shift_ref, o_ref):
    y = y_ref[...].astype(jnp.float32)
    o_ref[...] = jnp.maximum(y * scale_ref[...] + shift_ref[...],
                             0.0).astype(o_ref.dtype)


def block_forward(x, w, gamma, beta, *, eps=1e-5):
    """x: [N, Cin, H, W] f32; w: [Cout, Cin, 3, 3] f32; gamma/beta: [Cout] f32.

    Returns the Block output in NCHW f32.
    """
    N, Cin, H, W = x.shape
    Cout = w.shape[0]
    KH = KW = 3
    stride = 2

    # bf16 feed for the MXU (accumulation stays f32 inside the kernel).
    xb = x.astype(jnp.bfloat16)
    wb = w.astype(jnp.bfloat16)

    # reflect padding (matches PyTorch padding_mode='reflect'; pure copy, exact)
    xp = jnp.pad(xb, ((0, 0), (0, 0), (1, 1), (1, 1)), mode="reflect")
    OH = (H + 2 - KH) // stride + 1
    OW = (W + 2 - KW) // stride + 1

    # Host-side im2col (see TODO in header), transposed to [K, M] with the K
    # axis ordered (ci, kh, kw) to match w.reshape(Cout, Cin*9).
    cols = []
    for kh in range(KH):
        for kw in range(KW):
            cols.append(xp[:, :, kh:kh + stride * OH:stride,
                           kw:kw + stride * OW:stride])
    M = N * OH * OW
    K = Cin * KH * KW
    patches_t = (jnp.stack(cols, axis=0)          # [9, N, Cin, OH, OW]
                 .transpose(2, 0, 1, 3, 4)        # [Cin, 9, N, OH, OW]
                 .reshape(K, M))
    w_mat = wb.reshape(Cout, K)                   # [Cout, K]

    # ---- padding / tiling: Cout -> 8 sublanes, K -> 8, M -> lane-dense tiles.
    C_pads = _round_up(Cout, 8)
    K_pad = _round_up(K, 8)
    tm = min(1024, _round_up(M, 128))
    M_pad = _round_up(M, tm)
    nm = M_pad // tm
    if nm == 1 and M_pad % 256 == 0:
        # prefer >= 2 row tiles so the "parallel" M axis can use both v7x cores
        tm = M_pad // 2                           # stays a multiple of 128
        nm = 2

    w_p = jnp.zeros((C_pads, K_pad), jnp.bfloat16).at[:Cout, :K].set(w_mat)
    p_p = jnp.zeros((K_pad, M_pad), jnp.bfloat16).at[:K, :M].set(patches_t)

    # 48 MiB fits v7x's 64 MiB physical VMEM; v5e/v6e (128 MiB) could go higher.
    vmem_limit = 48 * 1024 * 1024

    # ---------------- pass 1: conv matmul + per-tile channel stats ----------
    y, psum, psq = pl.pallas_call(
        _conv_stats_kernel,
        out_shape=(
            jax.ShapeDtypeStruct((C_pads, M_pad), jnp.bfloat16),
            jax.ShapeDtypeStruct((nm, C_pads, 8), jnp.float32),
            jax.ShapeDtypeStruct((nm, C_pads, 8), jnp.float32),
        ),
        grid_spec=pltpu.PrefetchScalarGridSpec(
            num_scalar_prefetch=0,
            grid=(nm,),
            in_specs=[
                pl.BlockSpec((C_pads, K_pad), lambda i: (0, 0)),   # resident
                pl.BlockSpec((K_pad, tm), lambda i: (0, i)),
            ],
            out_specs=(
                pl.BlockSpec((C_pads, tm), lambda i: (0, i)),
                pl.BlockSpec((1, C_pads, 8), lambda i: (i, 0, 0)),
                pl.BlockSpec((1, C_pads, 8), lambda i: (i, 0, 0)),
            ),
        ),
        compiler_params=pltpu.CompilerParams(
            dimension_semantics=("parallel",),
            vmem_limit_bytes=vmem_limit,
        ),
    )(w_p, p_p)

    # ---- tiny per-channel reduction + BN parameter folding (plain JAX) -----
    # Padded K rows / M columns of p_p are exactly zero and `count` is the true
    # M, so padding does not perturb the statistics.
    count = jnp.float32(M)
    sum_c = psum[:, :, 0].sum(axis=0)             # (C_pads,)
    sq_c = psq[:, :, 0].sum(axis=0)
    mean = sum_c / count
    var = jnp.maximum(sq_c / count - mean * mean, 0.0)

    gamma_p = jnp.zeros((C_pads,), jnp.float32).at[:Cout].set(gamma.astype(jnp.float32))
    beta_p = jnp.zeros((C_pads,), jnp.float32).at[:Cout].set(beta.astype(jnp.float32))
    scale = gamma_p * jax.lax.rsqrt(var + eps)
    shift = beta_p - mean * scale
    scale = scale.reshape(C_pads, 1)
    shift = shift.reshape(C_pads, 1)

    # ---------------- pass 2: scale/shift + ReLU, written in place on y ------
    out_flat = pl.pallas_call(
        _bn_relu_kernel,
        out_shape=jax.ShapeDtypeStruct((C_pads, M_pad), jnp.bfloat16),
        grid_spec=pltpu.PrefetchScalarGridSpec(
            num_scalar_prefetch=0,
            grid=(nm,),
            in_specs=[
                pl.BlockSpec((C_pads, tm), lambda i: (0, i)),
                pl.BlockSpec((C_pads, 1), lambda i: (0, 0)),
                pl.BlockSpec((C_pads, 1), lambda i: (0, 0)),
            ],
            out_specs=pl.BlockSpec((C_pads, tm), lambda i: (0, i)),
        ),
        input_output_aliases={0: 0},              # BN+ReLU in place on y
        compiler_params=pltpu.CompilerParams(
            dimension_semantics=("parallel",),
            vmem_limit_bytes=vmem_limit,
        ),
    )(y, scale, shift)

    # Strip padding; [Cout, N*OH*OW] is already channel-major, one leading-axis
    # swap back to NCHW remains (see TODO in header).
    out = out_flat[:Cout, :M].astype(jnp.float32).reshape(Cout, N, OH, OW)
    return out.transpose(1, 0, 2, 3)


def _reference_forward(x, w, gamma, beta):
    """Pure-JAX f32 reference (no Pallas) for the correctness check."""
    xp = jnp.pad(x, ((0, 0), (0, 0), (1, 1), (1, 1)), mode="reflect")
    y = jax.lax.conv_general_dilated(
        xp, w, window_strides=(2, 2), padding="VALID",
        dimension_numbers=("NCHW", "OIHW", "NCHW"))
    mean = jnp.mean(y, axis=(0, 2, 3), keepdims=True)
    var = jnp.mean((y - mean) ** 2, axis=(0, 2, 3), keepdims=True)
    y = (y - mean) * jax.lax.rsqrt(var + 1e-5)
    y = y * gamma.reshape(1, -1, 1, 1) + beta.reshape(1, -1, 1, 1)
    return jnp.maximum(y, 0.0)


if __name__ == "__main__":
    # Block(in_channels=4, out_channels=8, down=True, act='relu', use_dropout=False)
    N, Cin, Cout, H, W = 2, 4, 8, 16, 16

    key = jax.random.PRNGKey(0)
    kx, kw = jax.random.split(key)
    x = jax.random.normal(kx, (N, Cin, H, W), dtype=jnp.float32)
    w = jax.random.normal(kw, (Cout, Cin, 3, 3), dtype=jnp.float32) * 0.1
    gamma = jnp.ones((Cout,), dtype=jnp.float32)
    beta = jnp.zeros((Cout,), dtype=jnp.float32)

    out = jax.block_until_ready(block_forward(x, w, gamma, beta))

    ref = _reference_forward(x, w, gamma, beta)
    assert out.shape == (N, Cout, H // 2, W // 2), out.shape
    max_err = float(jnp.max(jnp.abs(out - ref)))
    # Tolerance loosened vs. the f32 reference: bf16 MXU feed + bf16 y store.
    assert max_err < 6e-2, max_err

    print("KERNEL_OK")
</pallas_src>

<mosaic_0001>
module attributes {stable_mosaic.version = 11 : i64} {
  func.func @_conv_stats_kernel(%arg0: i32, %arg1: memref<8x40xbf16, #tpu.memory_space<vmem>>, %arg2: memref<40x128xbf16, #tpu.memory_space<vmem>>, %arg3: memref<8x128xbf16, #tpu.memory_space<vmem>>, %arg4: memref<1x8x8xf32, #tpu.memory_space<vmem>>, %arg5: memref<1x8x8xf32, #tpu.memory_space<vmem>>) attributes {dimension_semantics = [#tpu.dimension_semantics<parallel>], iteration_bounds = array<i64: 1>, scalar_prefetch = 0 : i64, scratch_operands = 0 : i64, tpu.core_type = #tpu.core_type<tc>, window_params = [{pipeline_mode = #tpu.pipeline_mode<synchronous>, transform_indices = @transform_0, window_bounds = array<i64: 8, 40>}, {transform_indices = @transform_1, window_bounds = array<i64: 40, 128>}, {transform_indices = @transform_2, window_bounds = array<i64: 8, 128>}, {transform_indices = @transform_3, window_bounds = array<i64: 1, 8, 8>}, {transform_indices = @transform_4, window_bounds = array<i64: 1, 8, 8>}]} {
    %c0 = arith.constant 0 : index
    %c0_0 = arith.constant 0 : index
    %0 = vector.load %arg1[%c0, %c0_0] : memref<8x40xbf16, #tpu.memory_space<vmem>>, vector<8x40xbf16>
    %c0_1 = arith.constant 0 : index
    %c0_2 = arith.constant 0 : index
    %1 = vector.load %arg2[%c0_1, %c0_2] : memref<40x128xbf16, #tpu.memory_space<vmem>>, vector<40x128xbf16>
    %cst = arith.constant dense<0.000000e+00> : vector<8x128xf32>
    %2 = tpu.matmul %0, %1, %cst {dimension_numbers = #tpu.dot_dimension_numbers<[1], [0], [0], [1], [0, 0, 1, 1], [], []>} : vector<8x40xbf16>, vector<40x128xbf16>, vector<8x128xf32> -> vector<8x128xf32>
    %3 = arith.truncf %2 : vector<8x128xf32> to vector<8x128xbf16>
    %c0_3 = arith.constant 0 : index
    %c0_4 = arith.constant 0 : index
    %4 = vector.load %arg3[%c0_3, %c0_4] : memref<8x128xbf16, #tpu.memory_space<vmem>>, vector<8x128xbf16>
    tpu.vector_store %arg3[%c0_3, %c0_4], %3 {strides = array<i32>} : memref<8x128xbf16, #tpu.memory_space<vmem>>, vector<8x128xbf16>,
    %cst_5 = arith.constant 1.000000e+00 : f32
    %5 = vector.broadcast %cst_5 : f32 to vector<128x8xf32>
    %cst_6 = arith.constant dense<0.000000e+00> : vector<8x8xf32>
    %6 = tpu.matmul %2, %5, %cst_6 {dimension_numbers = #tpu.dot_dimension_numbers<[1], [0], [0], [1], [0, 0, 1, 1], [], []>} : vector<8x128xf32>, vector<128x8xf32>, vector<8x8xf32> -> vector<8x8xf32>
    %c0_7 = arith.constant 0 : index
    %c0_8 = arith.constant 0 : index
    %c0_9 = arith.constant 0 : index
    %7 = vector.load %arg4[%c0_7, %c0_8, %c0_9] : memref<1x8x8xf32, #tpu.memory_space<vmem>>, vector<1x8x8xf32>
    %8 = vector.shape_cast %7 : vector<1x8x8xf32> to vector<8x8xf32>
    %9 = vector.shape_cast %6 : vector<8x8xf32> to vector<1x8x8xf32>
    tpu.vector_store %arg4[%c0_7, %c0_8, %c0_9], %9 {strides = array<i32>} : memref<1x8x8xf32, #tpu.memory_space<vmem>>, vector<1x8x8xf32>,
    %10 = arith.mulf %2, %2 : vector<8x128xf32>
    %cst_10 = arith.constant dense<0.000000e+00> : vector<8x8xf32>
    %11 = tpu.matmul %10, %5, %cst_10 {dimension_numbers = #tpu.dot_dimension_numbers<[1], [0], [0], [1], [0, 0, 1, 1], [], []>} : vector<8x128xf32>, vector<128x8xf32>, vector<8x8xf32> -> vector<8x8xf32>
    %c0_11 = arith.constant 0 : index
    %c0_12 = arith.constant 0 : index
    %c0_13 = arith.constant 0 : index
    %12 = vector.load %arg5[%c0_11, %c0_12, %c0_13] : memref<1x8x8xf32, #tpu.memory_space<vmem>>, vector<1x8x8xf32>
    %13 = vector.shape_cast %12 : vector<1x8x8xf32> to vector<8x8xf32>
    %14 = vector.shape_cast %11 : vector<8x8xf32> to vector<1x8x8xf32>
    tpu.vector_store %arg5[%c0_11, %c0_12, %c0_13], %14 {strides = array<i32>} : memref<1x8x8xf32, #tpu.memory_space<vmem>>, vector<1x8x8xf32>,
    return
  }
  func.func @transform_0(%arg0: i32) -> (i32, i32) {
    %c0_i32 = arith.constant 0 : i32
    %c0_i32_0 = arith.constant 0 : i32
    %c0_i32_1 = arith.constant 0 : i32
    return %c0_i32, %c0_i32_0 : i32, i32
  }
  func.func @transform_1(%arg0: i32) -> (i32, i32) {
    %c0_i32 = arith.constant 0 : i32
    %c0_i32_0 = arith.constant 0 : i32
    return %c0_i32, %arg0 : i32, i32
  }
  func.func @transform_2(%arg0: i32) -> (i32, i32) {
    %c0_i32 = arith.constant 0 : i32
    %c0_i32_0 = arith.constant 0 : i32
    return %c0_i32, %arg0 : i32, i32
  }
  func.func @transform_3(%arg0: i32) -> (i32, i32, i32) {
    %c0_i32 = arith.constant 0 : i32
    %c0_i32_0 = arith.constant 0 : i32
    %c0_i32_1 = arith.constant 0 : i32
    return %arg0, %c0_i32, %c0_i32_0 : i32, i32, i32
  }
  func.func @transform_4(%arg0: i32) -> (i32, i32, i32) {
    %c0_i32 = arith.constant 0 : i32
    %c0_i32_0 = arith.constant 0 : i32
    %c0_i32_1 = arith.constant 0 : i32
    return %arg0, %c0_i32, %c0_i32_0 : i32, i32, i32
  }
}

</mosaic_0001>

<bundles_post_ra>
// kernel: tpu_custom_call.1
= control target key start
LH: loop header
LB: loop body
LE: loop exit
PB: predicated region body
PF: predicated region fallthrough
CT: control target
= control target key end

     0   :  { %10 = vsyncpa [#allocation3], 0  ;;  %s702_s0 = inlined_call_operand.hbm [shape: bf16[8,40], index: 0, kind: input, shape index: {}]   ;;  %s703_s1 = inlined_call_operand.hbm [shape: bf16[40,128], index: 1, kind: input, shape index: {}]   ;;  %s704_s2 = inlined_call_operand.hbm [shape: bf16[8,128], index: 2, kind: output, shape index: {0}]   ;;  %s705_s3 = inlined_call_operand.hbm [shape: f32[1,8,8], index: 3, kind: output, shape index: {1}]   ;;  %s706_s4 = inlined_call_operand.hbm [shape: f32[1,8,8], index: 4, kind: output, shape index: {2}]  }
   0x1   :  { %11 = vsyncpa [#allocation6], 0 }
   0x2   :  { %12 = vsyncpa [#allocation4], 0 }
   0x3   :  { %13 = vsyncpa [#allocation9], 0  ;;  %s587_s15 = smov [#allocation2]   ;;  %s588_s17 = smov [#allocation5]  }
   0x4   :  { %s20_s16 = sshll.u32 %s587_s15, 4  ;;  %s29_s18 = sshll.u32 %s588_s17, 4  ;;  %s21_s16 = int_to_ptr.vmem [resolvable:$true] %s20_s16  ;;  %s623_s18 = int_to_ptr.vmem [resolvable:$true] %s29_s18 }
   0x5   :  { %s469_s21 = scalar_lea.hbm %s702_s0, 64 }
   0x6   :  { %p470_p0 = scmp.ne.s32.totalorder %s702_s0, %s469_s21  ;;  %p473_p1 = scmp.lt.u32.totalorder %s469_s21, %s702_s0 }
   0x8   :  { %p475_p2 = pnand %p473_p1, %p470_p0 }
   0xa   :  { %478 = shalt.err (!%p475_p2)
}
   0xb   :  { %s479_s26 = scalar_lea.vmem %s21_s16, 64  ;;  %p484_p4 = scmp.lt.s32.totalorder %s21_s16, %s21_s16 }
   0xc   :  { %p480_p3 = scmp.ne.s32.totalorder %s21_s16, %s479_s26  ;;  %p485_p5 = scmp.lt.s32.totalorder %s479_s26, %s479_s26 }
   0xe   :  { %p486_p6 = por %p485_p5, %p484_p4 }
  0x10   :  { %p487_p7 = pnand %p486_p6, %p480_p3 }
  0x12   :  { %490 = shalt.err (!%p487_p7)
}
  0x13   :  { %23 = dma.hbm_to_vmem [thread:$0]  %s702_s0, 64, %s21_s16, [#allocation3]  }
  0x14   :  { %s491_s5 = scalar_lea.hbm %s703_s1, 320 }
  0x15   :  { %p492_p8 = scmp.ne.s32.totalorder %s703_s1, %s491_s5  ;;  %p495_p9 = scmp.lt.u32.totalorder %s491_s5, %s703_s1 }
  0x17   :  { %p497_p10 = pnand %p495_p9, %p492_p8 }
  0x19   :  { %500 = shalt.err (!%p497_p10)
}
  0x1a   :  { %s501_s10 = scalar_lea.vmem %s623_s18, 320  ;;  %p506_p12 = scmp.lt.s32.totalorder %s623_s18, %s623_s18 }
  0x1b   :  { %p502_p11 = scmp.ne.s32.totalorder %s623_s18, %s501_s10  ;;  %p507_p13 = scmp.lt.s32.totalorder %s501_s10, %s501_s10 }
  0x1d   :  { %p508_p0 = por %p507_p13, %p506_p12 }
  0x1f   :  { %p509_p1 = pnand %p508_p0, %p502_p11 }
  0x21   :  { %512 = shalt.err (!%p509_p1)
}
  0x22   :  { %s589_s0 = smov 64   ;;  %s590_s11 = smov 4  }
  0x23   :  { %35 = dma.hbm_to_vmem [thread:$0]  %s703_s1, 320, %s623_s18, [#allocation6], %s589_s0, %s589_s0, %s590_s11  }
  0x24   :  { %579 = dma.done.wait [#allocation3], 64  }
  0x25   :  { %580 = vsyncadd [#allocation3], 4294967232 }
  0x26   :  { %581 = dma.done.wait [#allocation6], 320  }
  0x27   :  { %582 = vsyncadd [#allocation6], 4294966976  ;;  %v591_v0 = vmov 0.0   ;;  %vm592_vm0 = vmmov 0   ;;  %v593_v1 = vmov 0.0|0.0   ;;  %v466_v3 = vld [vmem:[#allocation5] sm:$0xff]  }
  0x28   :  { %343 = vmatprep.subr.bf16.mxu0 %v591_v0  ;;  %349 = vmatprep.mubr.msk.bf16.mxu0 %vm592_vm0, %v591_v0  ;;  %v594_v2 = vmov 1.0|1.0   ;;  %v467_v4 = vld [vmem:[#allocation5 + $0x8] sm:$0xff]   ;;  %v468_v5 = vld [vmem:[#allocation5 + $0x10] ss:$0 sps:$4 sm:$0xff]   ;;  %vm68_vm1 = vcmask 1043456  }
  0x29   :  { %423 = vmatprep.subr.bf16.mxu1 %v593_v1  ;;  %385 = vmatprep.mubr.msk.f32.mxu1 %vm592_vm0, %v591_v0  ;;  %v70_v6 = vsel %vm68_vm1, %v468_v5, 0  ;;  %v43_v7 = vld [vmem:[#allocation2] sm:$0xf]  ;;  %vm64_vm2 = vcmask 326656   ;;  %s595_s1 = smov [#allocation7]  }
  0x2a   :  { %424 = vmatpush3.bf16.msra.mxu1 %v594_v2  ;;  %344 = vmatpush3.bf16.msra.mxu0 %v466_v3  ;;  %s264_s14 = sshll.u32 %s595_s1, 4  ;;  %s265_s14 = int_to_ptr.vmem [resolvable:$true] %s264_s14 }
  0x2b   :  { %425 = vmatprep.subr.bf16.mxu1 %v593_v1  ;;  %345 = vmatprep.subr.bf16.mxu0 %v591_v0  ;;  %s513_s15 = scalar_lea.vmem %s265_s14, 64  ;;  %p518_p3 = scmp.lt.s32.totalorder %s265_s14, %s265_s14 }
  0x2c   :  { %p514_p2 = scmp.ne.s32.totalorder %s265_s14, %s513_s15  ;;  %p519_p4 = scmp.lt.s32.totalorder %s513_s15, %s513_s15 }
  0x2e   :  { %426 = vmatpush3.bf16.msra.mxu1 %v594_v2  ;;  %346 = vmatpush3.bf16.msra.mxu0 %v467_v4  ;;  %p520_p5 = por %p519_p4, %p518_p3 }
  0x2f   :  { %427 = vmatprep.subr.bf16.mxu1 %v593_v1  ;;  %347 = vmatprep.subr.bf16.mxu0 %v591_v0 }
  0x30   :  { %p521_p6 = pnand %p520_p5, %p514_p2 }
  0x32   :  { %428 = vmatpush3.bf16.msra.mxu1 %v594_v2  ;;  %348 = vmatpush3.bf16.msra.mxu0 %v70_v6 }
  0x33   :  { %429 = vmatprep.subr.bf16.mxu1 %v593_v1  ;;  %439 = vmatprep.subr.bf16.mxu0 %v593_v1 }
  0x35   :  { %350 = vmatmul.mubr.msk.bf16.vlgmr.msra.gmra.mrb[0].mxu0 %vm64_vm2, %v43_v7 }
  0x36   :  { %430 = vmatpush3.bf16.msra.mxu1 %v594_v2  ;;  %440 = vmatpush3.bf16.msra.mxu0 %v594_v2 }
  0x37   :  { %431 = vmatprep.subr.bf16.mxu1 %v593_v1  ;;  %420 = vmatprep.mubr.msk.f32.mxu0 %vm592_vm0, %v591_v0 }
  0x38   :  { %441 = vmatprep.subr.bf16.mxu0 %v593_v1 }
  0x3a   :  { %432 = vmatpush3.bf16.msra.mxu1 %v594_v2  ;;  %442 = vmatpush3.bf16.msra.mxu0 %v594_v2 }
  0x3b   :  { %433 = vmatprep.subr.bf16.mxu1 %v593_v1  ;;  %443 = vmatprep.subr.bf16.mxu0 %v593_v1 }
  0x3e   :  { %434 = vmatpush3.bf16.msra.mxu1 %v594_v2  ;;  %444 = vmatpush3.bf16.msra.mxu0 %v594_v2 }
  0x3f   :  { %435 = vmatprep.subr.bf16.mxu1 %v593_v1  ;;  %445 = vmatprep.subr.bf16.mxu0 %v593_v1 }
  0x42   :  { %436 = vmatpush3.bf16.msra.mxu1 %v594_v2  ;;  %446 = vmatpush3.bf16.msra.mxu0 %v594_v2 }
  0x43   :  { %437 = vmatprep.subr.bf16.mxu1 %v593_v1  ;;  %447 = vmatprep.subr.bf16.mxu0 %v593_v1 }
  0x46   :  { %438 = vmatpush3.bf16.msra.mxu1 %v594_v2  ;;  %448 = vmatpush3.bf16.msra.mxu0 %v594_v2 }
  0x47   :  { %449 = vmatprep.subr.bf16.mxu0 %v593_v1 }
  0x4a   :  { %450 = vmatpush3.bf16.msra.mxu0 %v594_v2 }
  0x4b   :  { %451 = vmatprep.subr.bf16.mxu0 %v593_v1 }
  0x4e   :  { %452 = vmatpush3.bf16.msra.mxu0 %v594_v2 }
  0x4f   :  { %453 = vmatprep.subr.bf16.mxu0 %v593_v1 }
  0x52   :  { %454 = vmatpush3.bf16.msra.mxu0 %v594_v2 }
 0x108   :  { %v106_v8 = vpop.f32.mrb[0].mxu0 }
 0x109   :  { %v112_v9 = vpack.c.bf16 %v106_v8, %v106_v8  ;;  %v186_v10 = vmul.f32 %v106_v8, %v106_v8  ;;  %v351_v11 = vpop.f32.mrb[1].mxu0  ;;  %386 = vmatmul.mubr.f32.vlgmr.msra.gmra.mrb[0].mxu1 %v106_v8 }
 0x10a   :  { %v109_v12 = vpop.f32.mrb[2].mxu0 }
 0x10b   :  { %113 = vst [vmem:[#allocation7] sm:$0xf] %v112_v9  ;;  %v352_v13 = vpop.f32.mrb[3].mxu0  ;;  %421 = vmatmul.mubr.f32.vlgmr.msra.gmra.mrb[4].mxu0 %v186_v10 }
 0x10c   :  { %524 = shalt.err (!%p521_p6)
}
 0x10d   :  { %s525_s18 = scalar_lea.hbm %s704_s2, 64 }
 0x10e   :  { %p526_p7 = scmp.ne.s32.totalorder %s704_s2, %s525_s18  ;;  %p529_p8 = scmp.lt.u32.totalorder %s525_s18, %s704_s2 }
 0x110   :  { %p531_p9 = pnand %p529_p8, %p526_p7 }
 0x112   :  { %534 = shalt.err (!%p531_p9)
}
 0x113   :  { %267 = dma.vmem_to_hbm [thread:$0]  %s265_s14, 64, %s704_s2, [#allocation4]   ;;  %vm184_vm3 = vcmask 64512  }
 0x114   :  { %s596_s25 = smov [#allocation8]   ;;  %s597_s27 = smov [#allocation10]  }
 0x115   :  { %s274_s26 = sshll.u32 %s596_s25, 4  ;;  %s284_s28 = sshll.u32 %s597_s27, 4  ;;  %s275_s26 = int_to_ptr.vmem [resolvable:$true] %s274_s26  ;;  %s670_s28 = int_to_ptr.vmem [resolvable:$true] %s284_s28 }
 0x116   :  { %s535_s29 = scalar_lea.vmem %s275_s26, 128  ;;  %p540_p11 = scmp.lt.s32.totalorder %s275_s26, %s275_s26 }
 0x117   :  { %p536_p10 = scmp.ne.s32.totalorder %s275_s26, %s535_s29  ;;  %p541_p12 = scmp.lt.s32.totalorder %s535_s29, %s535_s29 }
 0x119   :  { %p542_p13 = por %p541_p12, %p540_p11 }
 0x11b   :  { %p543_p0 = pnand %p542_p13, %p536_p10 }
 0x1dc   :  { %v180_v14 = vpop.f32.mrb[0].mxu1 }
 0x1dd   :  { %v387_v15 = vpop.f32.mrb[1].mxu1  ;;  %185 = vst.msk [vmem:[#allocation8] sm:$0xff] %vm184_vm3, %v180_v14 }
 0x1de   :  { %v253_v16 = vpop.f32.mrb[4].mxu0 }
 0x1df   :  { %546 = shalt.err (!%p543_p0)
}
 0x1e0   :  { %s547_s5 = scalar_lea.hbm %s705_s3, 128 }
 0x1e1   :  { %p548_p1 = scmp.ne.s32.totalorder %s705_s3, %s547_s5  ;;  %p551_p2 = scmp.lt.u32.totalorder %s547_s5, %s705_s3 }
 0x1e3   :  { %p553_p3 = pnand %p551_p2, %p548_p1 }
 0x1e5   :  { %556 = shalt.err (!%p553_p3)
}
 0x1e6   :  { %277 = dma.vmem_to_hbm [thread:$0]  %s275_s26, 128, %s705_s3, [#allocation9]   ;;  %257 = vst.msk [vmem:[#allocation10] sm:$0xff] %vm184_vm3, %v253_v16  ;;  %v422_v17 = vpop.f32.mrb[5].mxu0 }
 0x1e7   :  { %s557_s11 = scalar_lea.vmem %s670_s28, 128  ;;  %p562_p5 = scmp.lt.s32.totalorder %s670_s28, %s670_s28 }
 0x1e8   :  { %p558_p4 = scmp.ne.s32.totalorder %s670_s28, %s557_s11  ;;  %p563_p6 = scmp.lt.s32.totalorder %s557_s11, %s557_s11 }
 0x1ea   :  { %p564_p7 = por %p563_p6, %p562_p5 }
 0x1ec   :  { %p565_p8 = pnand %p564_p7, %p558_p4 }
 0x1ee   :  { %568 = shalt.err (!%p565_p8)
}
 0x1ef   :  { %s569_s1 = scalar_lea.hbm %s706_s4, 128 }
 0x1f0   :  { %p570_p9 = scmp.ne.s32.totalorder %s706_s4, %s569_s1  ;;  %p573_p10 = scmp.lt.u32.totalorder %s569_s1, %s706_s4 }
 0x1f2   :  { %p575_p11 = pnand %p573_p10, %p570_p9 }
 0x1f4   :  { %578 = shalt.err (!%p575_p11)
}
 0x1f5   :  { %287 = dma.vmem_to_hbm [thread:$0]  %s670_s28, 128, %s706_s4, [#allocation9]  }
 0x1f6   :  { %583 = dma.done.wait [#allocation4], 64  }
 0x1f7   :  { %584 = vsyncadd [#allocation4], 4294967232 }
 0x1f8   :  { %585 = dma.done.wait [#allocation9], 256  }
 0x1f9   :  { %586 = vsyncadd [#allocation9], 4294967040 }
 0x1fa   :  { %297 = vsyncpa [#allocation3], 1 }
 0x1fb   :  { %298 = vsyncpa [#allocation6], 1 }
 0x1fc   :  { %299 = vsyncpa [#allocation4], 1 }
 0x1fd   :  { %300 = vsyncpa [#allocation9], 1 }

</bundles_post_ra>
